<compile_context>
chip_gen: v7x
topology: tpu7x:2x2x1
jax: 0.10.0
libtpu: 0.0.40
codegen_flags: <defaults>
</compile_context>

<pallas_src>
import numpy as np
import jax
import jax.numpy as jnp
from jax.experimental import pallas as pl
from jax.experimental.pallas import tpu as pltpu


# ----------------------------- fused Pallas kernel ------------------------- #

def _make_fused_kernel(order, bg, c_in, c_out, k, length):
    """Whole forward pass (all conv branches + all correlation steps) for one
    batch group of `bg` batch elements, entirely in VMEM / f32."""
    rows = bg * c_out

    def kernel(x_ref, w_ref, o_ref):
        # x_ref: (1, bg*c_in, L)                rows are b*c_in + i
        # w_ref: (order*bg*c_out, k*bg*c_in+1)  all branches, block-diag in b,
        #                                       last column = bias
        # o_ref: (1, bg*c_out, L)               rows are b*c_out + o
        x2 = x_ref[0].astype(jnp.float32)                           # (bg*c_in, L)
        lane = jax.lax.broadcasted_iota(jnp.int32, (1, length), 1)  # hoisted once

        # Shifted causal windows via pltpu.roll (XLU) + iota lane mask — no
        # zero-concat + misaligned re-slicing. Stacked over taps, plus a ones
        # row so the bias rides along inside the single matmul below.
        parts = []
        for m in range(k):
            s = k - 1 - m                        # window m reads x[:, n - s]
            if s == 0:
                parts.append(x2)
            else:
                parts.append(jnp.where(lane >= s,
                                       pltpu.roll(x2, shift=s, axis=1), 0.0))
        parts.append(jnp.ones((1, length), jnp.float32))
        xs = jnp.concatenate(parts, axis=0)      # (k*bg*c_in + 1, L)

        # All `order` conv branches, all K taps, the whole batch group and the
        # bias in ONE MXU contraction (instead of order*K tiny matmuls).
        cv = jnp.dot(w_ref[...].astype(jnp.float32), xs,
                     preferred_element_type=jnp.float32)   # (order*bg*c_out, L)

        # multi_way_correlation: pairwise prefix correlation + rsqrt(n+1) norm.
        # Normalizer computed once (EUP rsqrt) and reused for every step.
        norm = jax.lax.rsqrt((lane + 1).astype(jnp.float32))        # (1, L)
        acc = cv[0:rows, :]
        for r in range(1, order):
            inp = cv[r * rows:(r + 1) * rows, :]
            y = jnp.zeros((rows, length), jnp.float32)
            # NOTE: the unrolled roll+mask loop is ideal for small static L.
            # For large L switch to a Toeplitz-operand MXU matmul tiled over L
            # (and set vmem_limit_bytes) — matters for v7x's 64 MiB VMEM.
            for d in range(length):
                coef = acc[:, length - 1 - d:length - d]            # (rows, 1)
                win = inp if d == 0 else jnp.where(
                    lane >= d, pltpu.roll(inp, shift=d, axis=1), 0.0)
                y = y + coef * win
            acc = y * norm
        o_ref[0] = acc.astype(o_ref.dtype)

    return kernel


# ------------------------------ JAX wrappers ------------------------------- #

def _pack_weights(weights, biases, bg):
    """Pack all branches' (C_out, C_in, K) weights + biases into one matmul
    operand of shape (order*bg*C_out, K*bg*C_in + 1), block-diagonal over the
    within-group batch index (so one contraction covers the whole group)."""
    order = len(weights)
    c_out, c_in, k = weights[0].shape
    w = jnp.stack(weights).astype(jnp.float32)          # (order, c_out, c_in, k)
    eye = jnp.eye(bg, dtype=jnp.float32)                # block-diag in batch
    # w6[r, b, o, m, b2, i] = w[r, o, i, m] * (b == b2)
    w6 = jnp.einsum('roik,bc->rbokci', w, eye)
    w_mat = w6.reshape(order * bg * c_out, k * bg * c_in)
    b = jnp.stack(biases).astype(jnp.float32)           # (order, c_out)
    b_col = jnp.broadcast_to(b[:, None, :], (order, bg, c_out)).reshape(
        order * bg * c_out, 1)
    return jnp.concatenate([w_mat, b_col], axis=1)      # bias folded into matmul


def diag_auto_correlation(x, weights, biases, batch_group=None):
    """DiagAutoCorrelation.forward, fully fused into a single pallas_call.

    x: (B, C_in, L); weights[i]: (C_out, C_in, K); biases[i]: (C_out,).
    batch_group: batch elements folded per grid step (default: all of them).
    """
    b_total, c_in, length = x.shape
    order = len(weights)
    c_out, _, k = weights[0].shape
    bg = b_total if batch_group is None else batch_group
    assert b_total % bg == 0
    g = b_total // bg

    w_big = _pack_weights(weights, biases, bg)          # (order*bg*C_out, K*bg*C_in+1)
    x_g = x.reshape(g, bg * c_in, length)               # layout plumbing (host side)
    kernel = _make_fused_kernel(order, bg, c_in, c_out, k, length)

    out = pl.pallas_call(
        kernel,
        out_shape=jax.ShapeDtypeStruct((g, bg * c_out, length), x.dtype),
        grid_spec=pltpu.PrefetchScalarGridSpec(
            num_scalar_prefetch=0,
            grid=(g,),
            in_specs=[
                pl.BlockSpec((1, bg * c_in, length), lambda gi: (gi, 0, 0)),
                pl.BlockSpec(w_big.shape, lambda gi: (0, 0)),
            ],
            out_specs=pl.BlockSpec((1, bg * c_out, length), lambda gi: (gi, 0, 0)),
        ),
        # "parallel" so a multi-TC part (v7x) can shard grid steps across cores
        # when batch_group < B gives more than one step.
        compiler_params=pltpu.CompilerParams(dimension_semantics=("parallel",)),
    )(x_g, w_big)
    return out.reshape(b_total, c_out, length)


# ------------------------- numpy (FFT) reference --------------------------- #

def _np_paddedfft_prefix(x, kernel_size):
    L = x.shape[-1]
    pad = kernel_size - 1
    xp = np.pad(x, [(0, 0)] * (x.ndim - 1) + [(pad, 0)])
    N = L + kernel_size - 1
    return np.fft.rfft(xp, N, axis=-1), N


def _np_fftconv1d_prefix(x, w, b):
    L = x.shape[-1]
    K = w.shape[-1]
    xf, N = _np_paddedfft_prefix(x, K)
    wf = np.fft.rfft(w, N, axis=-1)
    cf = np.einsum('oik,bik->bok', np.conj(wf), xf)
    out = np.fft.irfft(cf, N, axis=-1)[:, :, :L]
    return out + b[None, :, None]


def _np_multiway(*args):
    L = args[0].shape[-1]
    norm = 1.0 / np.sqrt(np.arange(1, L + 1))
    acc = args[0]
    for inp in args[1:]:
        xf, N = _np_paddedfft_prefix(inp, L)
        af = np.conj(np.fft.rfft(acc, N, axis=-1))
        acc = np.fft.irfft(af * xf, N, axis=-1)[:, :, :L]
        acc = acc * norm
    return acc


# ---------------------------------- main ----------------------------------- #

if __name__ == "__main__":
    B, C_in, C_out, K, L = 2, 4, 4, 4, 16
    order = 3

    key = jax.random.PRNGKey(0)
    keys = jax.random.split(key, 2 * order + 1)

    # FFTConv1d init='normal': k = groups / (in_channels * kernel_size)
    kscale = float(np.sqrt(1.0 / (C_in * K)))
    weights = [kscale * jax.random.normal(keys[i], (C_out, C_in, K), jnp.float32)
               for i in range(order)]
    biases = [kscale * jax.random.normal(keys[order + i], (C_out,), jnp.float32)
              for i in range(order)]
    x = jax.random.normal(keys[2 * order], (B, C_in, L), jnp.float32)

    out = diag_auto_correlation(x, weights, biases)
    out = jax.block_until_ready(out)

    # Verify against an FFT-based float64 numpy reference of the torch module.
    x_np = np.asarray(x, dtype=np.float64)
    convs_np = [_np_fftconv1d_prefix(x_np,
                                     np.asarray(w, dtype=np.float64),
                                     np.asarray(b, dtype=np.float64))
                for w, b in zip(weights, biases)]
    ref = _np_multiway(*convs_np)

    np.testing.assert_allclose(np.asarray(out), ref, rtol=1e-4, atol=1e-5)
    assert out.shape == (B, C_out, L)
    print("KERNEL_OK")
</pallas_src>

<mosaic_0001>
module attributes {stable_mosaic.version = 11 : i64} {
  func.func @kernel(%arg0: i32, %arg1: memref<1x8x16xf32, #tpu.memory_space<vmem>>, %arg2: memref<24x33xf32, #tpu.memory_space<vmem>>, %arg3: memref<1x8x16xf32, #tpu.memory_space<vmem>>) attributes {dimension_semantics = [#tpu.dimension_semantics<parallel>], iteration_bounds = array<i64: 1>, scalar_prefetch = 0 : i64, scratch_operands = 0 : i64, tpu.core_type = #tpu.core_type<tc>, window_params = [{transform_indices = @transform_0, window_bounds = array<i64: 1, 8, 16>}, {pipeline_mode = #tpu.pipeline_mode<synchronous>, transform_indices = @transform_1, window_bounds = array<i64: 24, 33>}, {transform_indices = @transform_2, window_bounds = array<i64: 1, 8, 16>}]} {
    %c0 = arith.constant 0 : index
    %c0_0 = arith.constant 0 : index
    %c0_1 = arith.constant 0 : index
    %0 = vector.load %arg1[%c0, %c0_0, %c0_1] : memref<1x8x16xf32, #tpu.memory_space<vmem>>, vector<1x8x16xf32>
    %1 = vector.shape_cast %0 : vector<1x8x16xf32> to vector<8x16xf32>
    %2 = tpu.iota {dimensions = array<i32: 1>} : vector<1x16xi32>
    %c3_i32 = arith.constant 3 : i32
    %3 = vector.broadcast %c3_i32 : i32 to vector<1x16xi32>
    %4 = arith.cmpi sge, %2, %3 : vector<1x16xi32>
    %c3_i32_2 = arith.constant 3 : i32
    %5 = tpu.dynamic_rotate %1 by %c3_i32_2 dim 1 : vector<8x16xf32>, i32 -> vector<8x16xf32>
    %cst = arith.constant 0.000000e+00 : f32
    %6 = vector.shape_cast %4 : vector<1x16xi1> to vector<1x16xi1>
    %7 = vector.broadcast %6 : vector<1x16xi1> to vector<8x16xi1>
    %8 = vector.broadcast %cst : f32 to vector<8x16xf32>
    %9 = arith.select %7, %5, %8 : vector<8x16xi1>, vector<8x16xf32>
    %c2_i32 = arith.constant 2 : i32
    %10 = vector.broadcast %c2_i32 : i32 to vector<1x16xi32>
    %11 = arith.cmpi sge, %2, %10 : vector<1x16xi32>
    %c2_i32_3 = arith.constant 2 : i32
    %12 = tpu.dynamic_rotate %1 by %c2_i32_3 dim 1 : vector<8x16xf32>, i32 -> vector<8x16xf32>
    %cst_4 = arith.constant 0.000000e+00 : f32
    %13 = vector.shape_cast %11 : vector<1x16xi1> to vector<1x16xi1>
    %14 = vector.broadcast %13 : vector<1x16xi1> to vector<8x16xi1>
    %15 = vector.broadcast %cst_4 : f32 to vector<8x16xf32>
    %16 = arith.select %14, %12, %15 : vector<8x16xi1>, vector<8x16xf32>
    %c1_i32 = arith.constant 1 : i32
    %17 = vector.broadcast %c1_i32 : i32 to vector<1x16xi32>
    %18 = arith.cmpi sge, %2, %17 : vector<1x16xi32>
    %c1_i32_5 = arith.constant 1 : i32
    %19 = tpu.dynamic_rotate %1 by %c1_i32_5 dim 1 : vector<8x16xf32>, i32 -> vector<8x16xf32>
    %cst_6 = arith.constant 0.000000e+00 : f32
    %20 = vector.shape_cast %18 : vector<1x16xi1> to vector<1x16xi1>
    %21 = vector.broadcast %20 : vector<1x16xi1> to vector<8x16xi1>
    %22 = vector.broadcast %cst_6 : f32 to vector<8x16xf32>
    %23 = arith.select %21, %19, %22 : vector<8x16xi1>, vector<8x16xf32>
    %cst_7 = arith.constant 1.000000e+00 : f32
    %24 = vector.broadcast %cst_7 : f32 to vector<1x16xf32>
    %25 = tpu.concatenate %9, %16, %23, %1, %24 in 0 : vector<8x16xf32>, vector<8x16xf32>, vector<8x16xf32>, vector<8x16xf32>, vector<1x16xf32> -> vector<33x16xf32>
    %c0_8 = arith.constant 0 : index
    %c0_9 = arith.constant 0 : index
    %26 = vector.load %arg2[%c0_8, %c0_9] : memref<24x33xf32, #tpu.memory_space<vmem>>, vector<24x33xf32>
    %cst_10 = arith.constant dense<0.000000e+00> : vector<24x16xf32>
    %27 = tpu.matmul %26, %25, %cst_10 {dimension_numbers = #tpu.dot_dimension_numbers<[1], [0], [0], [1], [0, 0, 1, 1], [], []>} : vector<24x33xf32>, vector<33x16xf32>, vector<24x16xf32> -> vector<24x16xf32>
    %c1_i32_11 = arith.constant 1 : i32
    %28 = vector.broadcast %c1_i32_11 : i32 to vector<1x16xi32>
    %29 = arith.addi %2, %28 : vector<1x16xi32>
    %30 = arith.sitofp %29 : vector<1x16xi32> to vector<1x16xf32>
    %31 = math.rsqrt %30 : vector<1x16xf32>
    %32 = vector.extract_strided_slice %27 {offsets = [0, 0], sizes = [8, 16], strides = [1, 1]} : vector<24x16xf32> to vector<8x16xf32>
    %33 = vector.extract_strided_slice %27 {offsets = [8, 0], sizes = [8, 16], strides = [1, 1]} : vector<24x16xf32> to vector<8x16xf32>
    %cst_12 = arith.constant 0.000000e+00 : f32
    %34 = vector.broadcast %cst_12 : f32 to vector<8x16xf32>
    %35 = vector.extract_strided_slice %32 {offsets = [0, 15], sizes = [8, 1], strides = [1, 1]} : vector<8x16xf32> to vector<8x1xf32>
    %36 = vector.broadcast %35 : vector<8x1xf32> to vector<8x16xf32>
    %37 = arith.mulf %36, %33 : vector<8x16xf32>
    %38 = arith.addf %34, %37 : vector<8x16xf32>
    %39 = vector.extract_strided_slice %32 {offsets = [0, 14], sizes = [8, 1], strides = [1, 1]} : vector<8x16xf32> to vector<8x1xf32>
    %c1_i32_13 = arith.constant 1 : i32
    %40 = vector.broadcast %c1_i32_13 : i32 to vector<1x16xi32>
    %41 = arith.cmpi sge, %2, %40 : vector<1x16xi32>
    %c1_i32_14 = arith.constant 1 : i32
    %42 = tpu.dynamic_rotate %33 by %c1_i32_14 dim 1 : vector<8x16xf32>, i32 -> vector<8x16xf32>
    %cst_15 = arith.constant 0.000000e+00 : f32
    %43 = vector.shape_cast %41 : vector<1x16xi1> to vector<1x16xi1>
    %44 = vector.broadcast %43 : vector<1x16xi1> to vector<8x16xi1>
    %45 = vector.broadcast %cst_15 : f32 to vector<8x16xf32>
    %46 = arith.select %44, %42, %45 : vector<8x16xi1>, vector<8x16xf32>
    %47 = vector.broadcast %39 : vector<8x1xf32> to vector<8x16xf32>
    %48 = arith.mulf %47, %46 : vector<8x16xf32>
    %49 = arith.addf %38, %48 : vector<8x16xf32>
    %50 = vector.extract_strided_slice %32 {offsets = [0, 13], sizes = [8, 1], strides = [1, 1]} : vector<8x16xf32> to vector<8x1xf32>
    %c2_i32_16 = arith.constant 2 : i32
    %51 = vector.broadcast %c2_i32_16 : i32 to vector<1x16xi32>
    %52 = arith.cmpi sge, %2, %51 : vector<1x16xi32>
    %c2_i32_17 = arith.constant 2 : i32
    %53 = tpu.dynamic_rotate %33 by %c2_i32_17 dim 1 : vector<8x16xf32>, i32 -> vector<8x16xf32>
    %cst_18 = arith.constant 0.000000e+00 : f32
    %54 = vector.shape_cast %52 : vector<1x16xi1> to vector<1x16xi1>
    %55 = vector.broadcast %54 : vector<1x16xi1> to vector<8x16xi1>
    %56 = vector.broadcast %cst_18 : f32 to vector<8x16xf32>
    %57 = arith.select %55, %53, %56 : vector<8x16xi1>, vector<8x16xf32>
    %58 = vector.broadcast %50 : vector<8x1xf32> to vector<8x16xf32>
    %59 = arith.mulf %58, %57 : vector<8x16xf32>
    %60 = arith.addf %49, %59 : vector<8x16xf32>
    %61 = vector.extract_strided_slice %32 {offsets = [0, 12], sizes = [8, 1], strides = [1, 1]} : vector<8x16xf32> to vector<8x1xf32>
    %c3_i32_19 = arith.constant 3 : i32
    %62 = vector.broadcast %c3_i32_19 : i32 to vector<1x16xi32>
    %63 = arith.cmpi sge, %2, %62 : vector<1x16xi32>
    %c3_i32_20 = arith.constant 3 : i32
    %64 = tpu.dynamic_rotate %33 by %c3_i32_20 dim 1 : vector<8x16xf32>, i32 -> vector<8x16xf32>
    %cst_21 = arith.constant 0.000000e+00 : f32
    %65 = vector.shape_cast %63 : vector<1x16xi1> to vector<1x16xi1>
    %66 = vector.broadcast %65 : vector<1x16xi1> to vector<8x16xi1>
    %67 = vector.broadcast %cst_21 : f32 to vector<8x16xf32>
    %68 = arith.select %66, %64, %67 : vector<8x16xi1>, vector<8x16xf32>
    %69 = vector.broadcast %61 : vector<8x1xf32> to vector<8x16xf32>
    %70 = arith.mulf %69, %68 : vector<8x16xf32>
    %71 = arith.addf %60, %70 : vector<8x16xf32>
    %72 = vector.extract_strided_slice %32 {offsets = [0, 11], sizes = [8, 1], strides = [1, 1]} : vector<8x16xf32> to vector<8x1xf32>
    %c4_i32 = arith.constant 4 : i32
    %73 = vector.broadcast %c4_i32 : i32 to vector<1x16xi32>
    %74 = arith.cmpi sge, %2, %73 : vector<1x16xi32>
    %c4_i32_22 = arith.constant 4 : i32
    %75 = tpu.dynamic_rotate %33 by %c4_i32_22 dim 1 : vector<8x16xf32>, i32 -> vector<8x16xf32>
    %cst_23 = arith.constant 0.000000e+00 : f32
    %76 = vector.shape_cast %74 : vector<1x16xi1> to vector<1x16xi1>
    %77 = vector.broadcast %76 : vector<1x16xi1> to vector<8x16xi1>
    %78 = vector.broadcast %cst_23 : f32 to vector<8x16xf32>
    %79 = arith.select %77, %75, %78 : vector<8x16xi1>, vector<8x16xf32>
    %80 = vector.broadcast %72 : vector<8x1xf32> to vector<8x16xf32>
    %81 = arith.mulf %80, %79 : vector<8x16xf32>
    %82 = arith.addf %71, %81 : vector<8x16xf32>
    %83 = vector.extract_strided_slice %32 {offsets = [0, 10], sizes = [8, 1], strides = [1, 1]} : vector<8x16xf32> to vector<8x1xf32>
    %c5_i32 = arith.constant 5 : i32
    %84 = vector.broadcast %c5_i32 : i32 to vector<1x16xi32>
    %85 = arith.cmpi sge, %2, %84 : vector<1x16xi32>
    %c5_i32_24 = arith.constant 5 : i32
    %86 = tpu.dynamic_rotate %33 by %c5_i32_24 dim 1 : vector<8x16xf32>, i32 -> vector<8x16xf32>
    %cst_25 = arith.constant 0.000000e+00 : f32
    %87 = vector.shape_cast %85 : vector<1x16xi1> to vector<1x16xi1>
    %88 = vector.broadcast %87 : vector<1x16xi1> to vector<8x16xi1>
    %89 = vector.broadcast %cst_25 : f32 to vector<8x16xf32>
    %90 = arith.select %88, %86, %89 : vector<8x16xi1>, vector<8x16xf32>
    %91 = vector.broadcast %83 : vector<8x1xf32> to vector<8x16xf32>
    %92 = arith.mulf %91, %90 : vector<8x16xf32>
    %93 = arith.addf %82, %92 : vector<8x16xf32>
    %94 = vector.extract_strided_slice %32 {offsets = [0, 9], sizes = [8, 1], strides = [1, 1]} : vector<8x16xf32> to vector<8x1xf32>
    %c6_i32 = arith.constant 6 : i32
    %95 = vector.broadcast %c6_i32 : i32 to vector<1x16xi32>
    %96 = arith.cmpi sge, %2, %95 : vector<1x16xi32>
    %c6_i32_26 = arith.constant 6 : i32
    %97 = tpu.dynamic_rotate %33 by %c6_i32_26 dim 1 : vector<8x16xf32>, i32 -> vector<8x16xf32>
    %cst_27 = arith.constant 0.000000e+00 : f32
    %98 = vector.shape_cast %96 : vector<1x16xi1> to vector<1x16xi1>
    %99 = vector.broadcast %98 : vector<1x16xi1> to vector<8x16xi1>
    %100 = vector.broadcast %cst_27 : f32 to vector<8x16xf32>
    %101 = arith.select %99, %97, %100 : vector<8x16xi1>, vector<8x16xf32>
    %102 = vector.broadcast %94 : vector<8x1xf32> to vector<8x16xf32>
    %103 = arith.mulf %102, %101 : vector<8x16xf32>
    %104 = arith.addf %93, %103 : vector<8x16xf32>
    %105 = vector.extract_strided_slice %32 {offsets = [0, 8], sizes = [8, 1], strides = [1, 1]} : vector<8x16xf32> to vector<8x1xf32>
    %c7_i32 = arith.constant 7 : i32
    %106 = vector.broadcast %c7_i32 : i32 to vector<1x16xi32>
    %107 = arith.cmpi sge, %2, %106 : vector<1x16xi32>
    %c7_i32_28 = arith.constant 7 : i32
    %108 = tpu.dynamic_rotate %33 by %c7_i32_28 dim 1 : vector<8x16xf32>, i32 -> vector<8x16xf32>
    %cst_29 = arith.constant 0.000000e+00 : f32
    %109 = vector.shape_cast %107 : vector<1x16xi1> to vector<1x16xi1>
    %110 = vector.broadcast %109 : vector<1x16xi1> to vector<8x16xi1>
    %111 = vector.broadcast %cst_29 : f32 to vector<8x16xf32>
    %112 = arith.select %110, %108, %111 : vector<8x16xi1>, vector<8x16xf32>
    %113 = vector.broadcast %105 : vector<8x1xf32> to vector<8x16xf32>
    %114 = arith.mulf %113, %112 : vector<8x16xf32>
    %115 = arith.addf %104, %114 : vector<8x16xf32>
    %116 = vector.extract_strided_slice %32 {offsets = [0, 7], sizes = [8, 1], strides = [1, 1]} : vector<8x16xf32> to vector<8x1xf32>
    %c8_i32 = arith.constant 8 : i32
    %117 = vector.broadcast %c8_i32 : i32 to vector<1x16xi32>
    %118 = arith.cmpi sge, %2, %117 : vector<1x16xi32>
    %c8_i32_30 = arith.constant 8 : i32
    %119 = tpu.dynamic_rotate %33 by %c8_i32_30 dim 1 : vector<8x16xf32>, i32 -> vector<8x16xf32>
    %cst_31 = arith.constant 0.000000e+00 : f32
    %120 = vector.shape_cast %118 : vector<1x16xi1> to vector<1x16xi1>
    %121 = vector.broadcast %120 : vector<1x16xi1> to vector<8x16xi1>
    %122 = vector.broadcast %cst_31 : f32 to vector<8x16xf32>
    %123 = arith.select %121, %119, %122 : vector<8x16xi1>, vector<8x16xf32>
    %124 = vector.broadcast %116 : vector<8x1xf32> to vector<8x16xf32>
    %125 = arith.mulf %124, %123 : vector<8x16xf32>
    %126 = arith.addf %115, %125 : vector<8x16xf32>
    %127 = vector.extract_strided_slice %32 {offsets = [0, 6], sizes = [8, 1], strides = [1, 1]} : vector<8x16xf32> to vector<8x1xf32>
    %c9_i32 = arith.constant 9 : i32
    %128 = vector.broadcast %c9_i32 : i32 to vector<1x16xi32>
    %129 = arith.cmpi sge, %2, %128 : vector<1x16xi32>
    %c9_i32_32 = arith.constant 9 : i32
    %130 = tpu.dynamic_rotate %33 by %c9_i32_32 dim 1 : vector<8x16xf32>, i32 -> vector<8x16xf32>
    %cst_33 = arith.constant 0.000000e+00 : f32
    %131 = vector.shape_cast %129 : vector<1x16xi1> to vector<1x16xi1>
    %132 = vector.broadcast %131 : vector<1x16xi1> to vector<8x16xi1>
    %133 = vector.broadcast %cst_33 : f32 to vector<8x16xf32>
    %134 = arith.select %132, %130, %133 : vector<8x16xi1>, vector<8x16xf32>
    %135 = vector.broadcast %127 : vector<8x1xf32> to vector<8x16xf32>
    %136 = arith.mulf %135, %134 : vector<8x16xf32>
    %137 = arith.addf %126, %136 : vector<8x16xf32>
    %138 = vector.extract_strided_slice %32 {offsets = [0, 5], sizes = [8, 1], strides = [1, 1]} : vector<8x16xf32> to vector<8x1xf32>
    %c10_i32 = arith.constant 10 : i32
    %139 = vector.broadcast %c10_i32 : i32 to vector<1x16xi32>
    %140 = arith.cmpi sge, %2, %139 : vector<1x16xi32>
    %c10_i32_34 = arith.constant 10 : i32
    %141 = tpu.dynamic_rotate %33 by %c10_i32_34 dim 1 : vector<8x16xf32>, i32 -> vector<8x16xf32>
    %cst_35 = arith.constant 0.000000e+00 : f32
    %142 = vector.shape_cast %140 : vector<1x16xi1> to vector<1x16xi1>
    %143 = vector.broadcast %142 : vector<1x16xi1> to vector<8x16xi1>
    %144 = vector.broadcast %cst_35 : f32 to vector<8x16xf32>
    %145 = arith.select %143, %141, %144 : vector<8x16xi1>, vector<8x16xf32>
    %146 = vector.broadcast %138 : vector<8x1xf32> to vector<8x16xf32>
    %147 = arith.mulf %146, %145 : vector<8x16xf32>
    %148 = arith.addf %137, %147 : vector<8x16xf32>
    %149 = vector.extract_strided_slice %32 {offsets = [0, 4], sizes = [8, 1], strides = [1, 1]} : vector<8x16xf32> to vector<8x1xf32>
    %c11_i32 = arith.constant 11 : i32
    %150 = vector.broadcast %c11_i32 : i32 to vector<1x16xi32>
    %151 = arith.cmpi sge, %2, %150 : vector<1x16xi32>
    %c11_i32_36 = arith.constant 11 : i32
    %152 = tpu.dynamic_rotate %33 by %c11_i32_36 dim 1 : vector<8x16xf32>, i32 -> vector<8x16xf32>
    %cst_37 = arith.constant 0.000000e+00 : f32
    %153 = vector.shape_cast %151 : vector<1x16xi1> to vector<1x16xi1>
    %154 = vector.broadcast %153 : vector<1x16xi1> to vector<8x16xi1>
    %155 = vector.broadcast %cst_37 : f32 to vector<8x16xf32>
    %156 = arith.select %154, %152, %155 : vector<8x16xi1>, vector<8x16xf32>
    %157 = vector.broadcast %149 : vector<8x1xf32> to vector<8x16xf32>
    %158 = arith.mulf %157, %156 : vector<8x16xf32>
    %159 = arith.addf %148, %158 : vector<8x16xf32>
    %160 = vector.extract_strided_slice %32 {offsets = [0, 3], sizes = [8, 1], strides = [1, 1]} : vector<8x16xf32> to vector<8x1xf32>
    %c12_i32 = arith.constant 12 : i32
    %161 = vector.broadcast %c12_i32 : i32 to vector<1x16xi32>
    %162 = arith.cmpi sge, %2, %161 : vector<1x16xi32>
    %c12_i32_38 = arith.constant 12 : i32
    %163 = tpu.dynamic_rotate %33 by %c12_i32_38 dim 1 : vector<8x16xf32>, i32 -> vector<8x16xf32>
    %cst_39 = arith.constant 0.000000e+00 : f32
    %164 = vector.shape_cast %162 : vector<1x16xi1> to vector<1x16xi1>
    %165 = vector.broadcast %164 : vector<1x16xi1> to vector<8x16xi1>
    %166 = vector.broadcast %cst_39 : f32 to vector<8x16xf32>
    %167 = arith.select %165, %163, %166 : vector<8x16xi1>, vector<8x16xf32>
    %168 = vector.broadcast %160 : vector<8x1xf32> to vector<8x16xf32>
    %169 = arith.mulf %168, %167 : vector<8x16xf32>
    %170 = arith.addf %159, %169 : vector<8x16xf32>
    %171 = vector.extract_strided_slice %32 {offsets = [0, 2], sizes = [8, 1], strides = [1, 1]} : vector<8x16xf32> to vector<8x1xf32>
    %c13_i32 = arith.constant 13 : i32
    %172 = vector.broadcast %c13_i32 : i32 to vector<1x16xi32>
    %173 = arith.cmpi sge, %2, %172 : vector<1x16xi32>
    %c13_i32_40 = arith.constant 13 : i32
    %174 = tpu.dynamic_rotate %33 by %c13_i32_40 dim 1 : vector<8x16xf32>, i32 -> vector<8x16xf32>
    %cst_41 = arith.constant 0.000000e+00 : f32
    %175 = vector.shape_cast %173 : vector<1x16xi1> to vector<1x16xi1>
    %176 = vector.broadcast %175 : vector<1x16xi1> to vector<8x16xi1>
    %177 = vector.broadcast %cst_41 : f32 to vector<8x16xf32>
    %178 = arith.select %176, %174, %177 : vector<8x16xi1>, vector<8x16xf32>
    %179 = vector.broadcast %171 : vector<8x1xf32> to vector<8x16xf32>
    %180 = arith.mulf %179, %178 : vector<8x16xf32>
    %181 = arith.addf %170, %180 : vector<8x16xf32>
    %182 = vector.extract_strided_slice %32 {offsets = [0, 1], sizes = [8, 1], strides = [1, 1]} : vector<8x16xf32> to vector<8x1xf32>
    %c14_i32 = arith.constant 14 : i32
    %183 = vector.broadcast %c14_i32 : i32 to vector<1x16xi32>
    %184 = arith.cmpi sge, %2, %183 : vector<1x16xi32>
    %c14_i32_42 = arith.constant 14 : i32
    %185 = tpu.dynamic_rotate %33 by %c14_i32_42 dim 1 : vector<8x16xf32>, i32 -> vector<8x16xf32>
    %cst_43 = arith.constant 0.000000e+00 : f32
    %186 = vector.shape_cast %184 : vector<1x16xi1> to vector<1x16xi1>
    %187 = vector.broadcast %186 : vector<1x16xi1> to vector<8x16xi1>
    %188 = vector.broadcast %cst_43 : f32 to vector<8x16xf32>
    %189 = arith.select %187, %185, %188 : vector<8x16xi1>, vector<8x16xf32>
    %190 = vector.broadcast %182 : vector<8x1xf32> to vector<8x16xf32>
    %191 = arith.mulf %190, %189 : vector<8x16xf32>
    %192 = arith.addf %181, %191 : vector<8x16xf32>
    %193 = vector.extract_strided_slice %32 {offsets = [0, 0], sizes = [8, 1], strides = [1, 1]} : vector<8x16xf32> to vector<8x1xf32>
    %c15_i32 = arith.constant 15 : i32
    %194 = vector.broadcast %c15_i32 : i32 to vector<1x16xi32>
    %195 = arith.cmpi sge, %2, %194 : vector<1x16xi32>
    %c15_i32_44 = arith.constant 15 : i32
    %196 = tpu.dynamic_rotate %33 by %c15_i32_44 dim 1 : vector<8x16xf32>, i32 -> vector<8x16xf32>
    %cst_45 = arith.constant 0.000000e+00 : f32
    %197 = vector.shape_cast %195 : vector<1x16xi1> to vector<1x16xi1>
    %198 = vector.broadcast %197 : vector<1x16xi1> to vector<8x16xi1>
    %199 = vector.broadcast %cst_45 : f32 to vector<8x16xf32>
    %200 = arith.select %198, %196, %199 : vector<8x16xi1>, vector<8x16xf32>
    %201 = vector.broadcast %193 : vector<8x1xf32> to vector<8x16xf32>
    %202 = arith.mulf %201, %200 : vector<8x16xf32>
    %203 = arith.addf %192, %202 : vector<8x16xf32>
    %204 = vector.broadcast %31 : vector<1x16xf32> to vector<8x16xf32>
    %205 = arith.mulf %203, %204 : vector<8x16xf32>
    %206 = vector.extract_strided_slice %27 {offsets = [16, 0], sizes = [8, 16], strides = [1, 1]} : vector<24x16xf32> to vector<8x16xf32>
    %cst_46 = arith.constant 0.000000e+00 : f32
    %207 = vector.broadcast %cst_46 : f32 to vector<8x16xf32>
    %208 = vector.extract_strided_slice %205 {offsets = [0, 15], sizes = [8, 1], strides = [1, 1]} : vector<8x16xf32> to vector<8x1xf32>
    %209 = vector.broadcast %208 : vector<8x1xf32> to vector<8x16xf32>
    %210 = arith.mulf %209, %206 : vector<8x16xf32>
    %211 = arith.addf %207, %210 : vector<8x16xf32>
    %212 = vector.extract_strided_slice %205 {offsets = [0, 14], sizes = [8, 1], strides = [1, 1]} : vector<8x16xf32> to vector<8x1xf32>
    %c1_i32_47 = arith.constant 1 : i32
    %213 = vector.broadcast %c1_i32_47 : i32 to vector<1x16xi32>
    %214 = arith.cmpi sge, %2, %213 : vector<1x16xi32>
    %c1_i32_48 = arith.constant 1 : i32
    %215 = tpu.dynamic_rotate %206 by %c1_i32_48 dim 1 : vector<8x16xf32>, i32 -> vector<8x16xf32>
    %cst_49 = arith.constant 0.000000e+00 : f32
    %216 = vector.shape_cast %214 : vector<1x16xi1> to vector<1x16xi1>
    %217 = vector.broadcast %216 : vector<1x16xi1> to vector<8x16xi1>
    %218 = vector.broadcast %cst_49 : f32 to vector<8x16xf32>
    %219 = arith.select %217, %215, %218 : vector<8x16xi1>, vector<8x16xf32>
    %220 = vector.broadcast %212 : vector<8x1xf32> to vector<8x16xf32>
    %221 = arith.mulf %220, %219 : vector<8x16xf32>
    %222 = arith.addf %211, %221 : vector<8x16xf32>
    %223 = vector.extract_strided_slice %205 {offsets = [0, 13], sizes = [8, 1], strides = [1, 1]} : vector<8x16xf32> to vector<8x1xf32>
    %c2_i32_50 = arith.constant 2 : i32
    %224 = vector.broadcast %c2_i32_50 : i32 to vector<1x16xi32>
    %225 = arith.cmpi sge, %2, %224 : vector<1x16xi32>
    %c2_i32_51 = arith.constant 2 : i32
    %226 = tpu.dynamic_rotate %206 by %c2_i32_51 dim 1 : vector<8x16xf32>, i32 -> vector<8x16xf32>
    %cst_52 = arith.constant 0.000000e+00 : f32
    %227 = vector.shape_cast %225 : vector<1x16xi1> to vector<1x16xi1>
    %228 = vector.broadcast %227 : vector<1x16xi1> to vector<8x16xi1>
    %229 = vector.broadcast %cst_52 : f32 to vector<8x16xf32>
    %230 = arith.select %228, %226, %229 : vector<8x16xi1>, vector<8x16xf32>
    %231 = vector.broadcast %223 : vector<8x1xf32> to vector<8x16xf32>
    %232 = arith.mulf %231, %230 : vector<8x16xf32>
    %233 = arith.addf %222, %232 : vector<8x16xf32>
    %234 = vector.extract_strided_slice %205 {offsets = [0, 12], sizes = [8, 1], strides = [1, 1]} : vector<8x16xf32> to vector<8x1xf32>
    %c3_i32_53 = arith.constant 3 : i32
    %235 = vector.broadcast %c3_i32_53 : i32 to vector<1x16xi32>
    %236 = arith.cmpi sge, %2, %235 : vector<1x16xi32>
    %c3_i32_54 = arith.constant 3 : i32
    %237 = tpu.dynamic_rotate %206 by %c3_i32_54 dim 1 : vector<8x16xf32>, i32 -> vector<8x16xf32>
    %cst_55 = arith.constant 0.000000e+00 : f32
    %238 = vector.shape_cast %236 : vector<1x16xi1> to vector<1x16xi1>
    %239 = vector.broadcast %238 : vector<1x16xi1> to vector<8x16xi1>
    %240 = vector.broadcast %cst_55 : f32 to vector<8x16xf32>
    %241 = arith.select %239, %237, %240 : vector<8x16xi1>, vector<8x16xf32>
    %242 = vector.broadcast %234 : vector<8x1xf32> to vector<8x16xf32>
    %243 = arith.mulf %242, %241 : vector<8x16xf32>
    %244 = arith.addf %233, %243 : vector<8x16xf32>
    %245 = vector.extract_strided_slice %205 {offsets = [0, 11], sizes = [8, 1], strides = [1, 1]} : vector<8x16xf32> to vector<8x1xf32>
    %c4_i32_56 = arith.constant 4 : i32
    %246 = vector.broadcast %c4_i32_56 : i32 to vector<1x16xi32>
    %247 = arith.cmpi sge, %2, %246 : vector<1x16xi32>
    %c4_i32_57 = arith.constant 4 : i32
    %248 = tpu.dynamic_rotate %206 by %c4_i32_57 dim 1 : vector<8x16xf32>, i32 -> vector<8x16xf32>
    %cst_58 = arith.constant 0.000000e+00 : f32
    %249 = vector.shape_cast %247 : vector<1x16xi1> to vector<1x16xi1>
    %250 = vector.broadcast %249 : vector<1x16xi1> to vector<8x16xi1>
    %251 = vector.broadcast %cst_58 : f32 to vector<8x16xf32>
    %252 = arith.select %250, %248, %251 : vector<8x16xi1>, vector<8x16xf32>
    %253 = vector.broadcast %245 : vector<8x1xf32> to vector<8x16xf32>
    %254 = arith.mulf %253, %252 : vector<8x16xf32>
    %255 = arith.addf %244, %254 : vector<8x16xf32>
    %256 = vector.extract_strided_slice %205 {offsets = [0, 10], sizes = [8, 1], strides = [1, 1]} : vector<8x16xf32> to vector<8x1xf32>
    %c5_i32_59 = arith.constant 5 : i32
    %257 = vector.broadcast %c5_i32_59 : i32 to vector<1x16xi32>
    %258 = arith.cmpi sge, %2, %257 : vector<1x16xi32>
    %c5_i32_60 = arith.constant 5 : i32
    %259 = tpu.dynamic_rotate %206 by %c5_i32_60 dim 1 : vector<8x16xf32>, i32 -> vector<8x16xf32>
    %cst_61 = arith.constant 0.000000e+00 : f32
    %260 = vector.shape_cast %258 : vector<1x16xi1> to vector<1x16xi1>
    %261 = vector.broadcast %260 : vector<1x16xi1> to vector<8x16xi1>
    %262 = vector.broadcast %cst_61 : f32 to vector<8x16xf32>
    %263 = arith.select %261, %259, %262 : vector<8x16xi1>, vector<8x16xf32>
    %264 = vector.broadcast %256 : vector<8x1xf32> to vector<8x16xf32>
    %265 = arith.mulf %264, %263 : vector<8x16xf32>
    %266 = arith.addf %255, %265 : vector<8x16xf32>
    %267 = vector.extract_strided_slice %205 {offsets = [0, 9], sizes = [8, 1], strides = [1, 1]} : vector<8x16xf32> to vector<8x1xf32>
    %c6_i32_62 = arith.constant 6 : i32
    %268 = vector.broadcast %c6_i32_62 : i32 to vector<1x16xi32>
    %269 = arith.cmpi sge, %2, %268 : vector<1x16xi32>
    %c6_i32_63 = arith.constant 6 : i32
    %270 = tpu.dynamic_rotate %206 by %c6_i32_63 dim 1 : vector<8x16xf32>, i32 -> vector<8x16xf32>
    %cst_64 = arith.constant 0.000000e+00 : f32
    %271 = vector.shape_cast %269 : vector<1x16xi1> to vector<1x16xi1>
    %272 = vector.broadcast %271 : vector<1x16xi1> to vector<8x16xi1>
    %273 = vector.broadcast %cst_64 : f32 to vector<8x16xf32>
    %274 = arith.select %272, %270, %273 : vector<8x16xi1>, vector<8x16xf32>
    %275 = vector.broadcast %267 : vector<8x1xf32> to vector<8x16xf32>
    %276 = arith.mulf %275, %274 : vector<8x16xf32>
    %277 = arith.addf %266, %276 : vector<8x16xf32>
    %278 = vector.extract_strided_slice %205 {offsets = [0, 8], sizes = [8, 1], strides = [1, 1]} : vector<8x16xf32> to vector<8x1xf32>
    %c7_i32_65 = arith.constant 7 : i32
    %279 = vector.broadcast %c7_i32_65 : i32 to vector<1x16xi32>
    %280 = arith.cmpi sge, %2, %279 : vector<1x16xi32>
    %c7_i32_66 = arith.constant 7 : i32
    %281 = tpu.dynamic_rotate %206 by %c7_i32_66 dim 1 : vector<8x16xf32>, i32 -> vector<8x16xf32>
    %cst_67 = arith.constant 0.000000e+00 : f32
    %282 = vector.shape_cast %280 : vector<1x16xi1> to vector<1x16xi1>
    %283 = vector.broadcast %282 : vector<1x16xi1> to vector<8x16xi1>
    %284 = vector.broadcast %cst_67 : f32 to vector<8x16xf32>
    %285 = arith.select %283, %281, %284 : vector<8x16xi1>, vector<8x16xf32>
    %286 = vector.broadcast %278 : vector<8x1xf32> to vector<8x16xf32>
    %287 = arith.mulf %286, %285 : vector<8x16xf32>
    %288 = arith.addf %277, %287 : vector<8x16xf32>
    %289 = vector.extract_strided_slice %205 {offsets = [0, 7], sizes = [8, 1], strides = [1, 1]} : vector<8x16xf32> to vector<8x1xf32>
    %c8_i32_68 = arith.constant 8 : i32
    %290 = vector.broadcast %c8_i32_68 : i32 to vector<1x16xi32>
    %291 = arith.cmpi sge, %2, %290 : vector<1x16xi32>
    %c8_i32_69 = arith.constant 8 : i32
    %292 = tpu.dynamic_rotate %206 by %c8_i32_69 dim 1 : vector<8x16xf32>, i32 -> vector<8x16xf32>
    %cst_70 = arith.constant 0.000000e+00 : f32
    %293 = vector.shape_cast %291 : vector<1x16xi1> to vector<1x16xi1>
    %294 = vector.broadcast %293 : vector<1x16xi1> to vector<8x16xi1>
    %295 = vector.broadcast %cst_70 : f32 to vector<8x16xf32>
    %296 = arith.select %294, %292, %295 : vector<8x16xi1>, vector<8x16xf32>
    %297 = vector.broadcast %289 : vector<8x1xf32> to vector<8x16xf32>
    %298 = arith.mulf %297, %296 : vector<8x16xf32>
    %299 = arith.addf %288, %298 : vector<8x16xf32>
    %300 = vector.extract_strided_slice %205 {offsets = [0, 6], sizes = [8, 1], strides = [1, 1]} : vector<8x16xf32> to vector<8x1xf32>
    %c9_i32_71 = arith.constant 9 : i32
    %301 = vector.broadcast %c9_i32_71 : i32 to vector<1x16xi32>
    %302 = arith.cmpi sge, %2, %301 : vector<1x16xi32>
    %c9_i32_72 = arith.constant 9 : i32
    %303 = tpu.dynamic_rotate %206 by %c9_i32_72 dim 1 : vector<8x16xf32>, i32 -> vector<8x16xf32>
    %cst_73 = arith.constant 0.000000e+00 : f32
    %304 = vector.shape_cast %302 : vector<1x16xi1> to vector<1x16xi1>
    %305 = vector.broadcast %304 : vector<1x16xi1> to vector<8x16xi1>
    %306 = vector.broadcast %cst_73 : f32 to vector<8x16xf32>
    %307 = arith.select %305, %303, %306 : vector<8x16xi1>, vector<8x16xf32>
    %308 = vector.broadcast %300 : vector<8x1xf32> to vector<8x16xf32>
    %309 = arith.mulf %308, %307 : vector<8x16xf32>
    %310 = arith.addf %299, %309 : vector<8x16xf32>
    %311 = vector.extract_strided_slice %205 {offsets = [0, 5], sizes = [8, 1], strides = [1, 1]} : vector<8x16xf32> to vector<8x1xf32>
    %c10_i32_74 = arith.constant 10 : i32
    %312 = vector.broadcast %c10_i32_74 : i32 to vector<1x16xi32>
    %313 = arith.cmpi sge, %2, %312 : vector<1x16xi32>
    %c10_i32_75 = arith.constant 10 : i32
    %314 = tpu.dynamic_rotate %206 by %c10_i32_75 dim 1 : vector<8x16xf32>, i32 -> vector<8x16xf32>
    %cst_76 = arith.constant 0.000000e+00 : f32
    %315 = vector.shape_cast %313 : vector<1x16xi1> to vector<1x16xi1>
    %316 = vector.broadcast %315 : vector<1x16xi1> to vector<8x16xi1>
    %317 = vector.broadcast %cst_76 : f32 to vector<8x16xf32>
    %318 = arith.select %316, %314, %317 : vector<8x16xi1>, vector<8x16xf32>
    %319 = vector.broadcast %311 : vector<8x1xf32> to vector<8x16xf32>
    %320 = arith.mulf %319, %318 : vector<8x16xf32>
    %321 = arith.addf %310, %320 : vector<8x16xf32>
    %322 = vector.extract_strided_slice %205 {offsets = [0, 4], sizes = [8, 1], strides = [1, 1]} : vector<8x16xf32> to vector<8x1xf32>
    %c11_i32_77 = arith.constant 11 : i32
    %323 = vector.broadcast %c11_i32_77 : i32 to vector<1x16xi32>
    %324 = arith.cmpi sge, %2, %323 : vector<1x16xi32>
    %c11_i32_78 = arith.constant 11 : i32
    %325 = tpu.dynamic_rotate %206 by %c11_i32_78 dim 1 : vector<8x16xf32>, i32 -> vector<8x16xf32>
    %cst_79 = arith.constant 0.000000e+00 : f32
    %326 = vector.shape_cast %324 : vector<1x16xi1> to vector<1x16xi1>
    %327 = vector.broadcast %326 : vector<1x16xi1> to vector<8x16xi1>
    %328 = vector.broadcast %cst_79 : f32 to vector<8x16xf32>
    %329 = arith.select %327, %325, %328 : vector<8x16xi1>, vector<8x16xf32>
    %330 = vector.broadcast %322 : vector<8x1xf32> to vector<8x16xf32>
    %331 = arith.mulf %330, %329 : vector<8x16xf32>
    %332 = arith.addf %321, %331 : vector<8x16xf32>
    %333 = vector.extract_strided_slice %205 {offsets = [0, 3], sizes = [8, 1], strides = [1, 1]} : vector<8x16xf32> to vector<8x1xf32>
    %c12_i32_80 = arith.constant 12 : i32
    %334 = vector.broadcast %c12_i32_80 : i32 to vector<1x16xi32>
    %335 = arith.cmpi sge, %2, %334 : vector<1x16xi32>
    %c12_i32_81 = arith.constant 12 : i32
    %336 = tpu.dynamic_rotate %206 by %c12_i32_81 dim 1 : vector<8x16xf32>, i32 -> vector<8x16xf32>
    %cst_82 = arith.constant 0.000000e+00 : f32
    %337 = vector.shape_cast %335 : vector<1x16xi1> to vector<1x16xi1>
    %338 = vector.broadcast %337 : vector<1x16xi1> to vector<8x16xi1>
    %339 = vector.broadcast %cst_82 : f32 to vector<8x16xf32>
    %340 = arith.select %338, %336, %339 : vector<8x16xi1>, vector<8x16xf32>
    %341 = vector.broadcast %333 : vector<8x1xf32> to vector<8x16xf32>
    %342 = arith.mulf %341, %340 : vector<8x16xf32>
    %343 = arith.addf %332, %342 : vector<8x16xf32>
    %344 = vector.extract_strided_slice %205 {offsets = [0, 2], sizes = [8, 1], strides = [1, 1]} : vector<8x16xf32> to vector<8x1xf32>
    %c13_i32_83 = arith.constant 13 : i32
    %345 = vector.broadcast %c13_i32_83 : i32 to vector<1x16xi32>
    %346 = arith.cmpi sge, %2, %345 : vector<1x16xi32>
    %c13_i32_84 = arith.constant 13 : i32
    %347 = tpu.dynamic_rotate %206 by %c13_i32_84 dim 1 : vector<8x16xf32>, i32 -> vector<8x16xf32>
    %cst_85 = arith.constant 0.000000e+00 : f32
    %348 = vector.shape_cast %346 : vector<1x16xi1> to vector<1x16xi1>
    %349 = vector.broadcast %348 : vector<1x16xi1> to vector<8x16xi1>
    %350 = vector.broadcast %cst_85 : f32 to vector<8x16xf32>
    %351 = arith.select %349, %347, %350 : vector<8x16xi1>, vector<8x16xf32>
    %352 = vector.broadcast %344 : vector<8x1xf32> to vector<8x16xf32>
    %353 = arith.mulf %352, %351 : vector<8x16xf32>
    %354 = arith.addf %343, %353 : vector<8x16xf32>
    %355 = vector.extract_strided_slice %205 {offsets = [0, 1], sizes = [8, 1], strides = [1, 1]} : vector<8x16xf32> to vector<8x1xf32>
    %c14_i32_86 = arith.constant 14 : i32
    %356 = vector.broadcast %c14_i32_86 : i32 to vector<1x16xi32>
    %357 = arith.cmpi sge, %2, %356 : vector<1x16xi32>
    %c14_i32_87 = arith.constant 14 : i32
    %358 = tpu.dynamic_rotate %206 by %c14_i32_87 dim 1 : vector<8x16xf32>, i32 -> vector<8x16xf32>
    %cst_88 = arith.constant 0.000000e+00 : f32
    %359 = vector.shape_cast %357 : vector<1x16xi1> to vector<1x16xi1>
    %360 = vector.broadcast %359 : vector<1x16xi1> to vector<8x16xi1>
    %361 = vector.broadcast %cst_88 : f32 to vector<8x16xf32>
    %362 = arith.select %360, %358, %361 : vector<8x16xi1>, vector<8x16xf32>
    %363 = vector.broadcast %355 : vector<8x1xf32> to vector<8x16xf32>
    %364 = arith.mulf %363, %362 : vector<8x16xf32>
    %365 = arith.addf %354, %364 : vector<8x16xf32>
    %366 = vector.extract_strided_slice %205 {offsets = [0, 0], sizes = [8, 1], strides = [1, 1]} : vector<8x16xf32> to vector<8x1xf32>
    %c15_i32_89 = arith.constant 15 : i32
    %367 = vector.broadcast %c15_i32_89 : i32 to vector<1x16xi32>
    %368 = arith.cmpi sge, %2, %367 : vector<1x16xi32>
    %c15_i32_90 = arith.constant 15 : i32
    %369 = tpu.dynamic_rotate %206 by %c15_i32_90 dim 1 : vector<8x16xf32>, i32 -> vector<8x16xf32>
    %cst_91 = arith.constant 0.000000e+00 : f32
    %370 = vector.shape_cast %368 : vector<1x16xi1> to vector<1x16xi1>
    %371 = vector.broadcast %370 : vector<1x16xi1> to vector<8x16xi1>
    %372 = vector.broadcast %cst_91 : f32 to vector<8x16xf32>
    %373 = arith.select %371, %369, %372 : vector<8x16xi1>, vector<8x16xf32>
    %374 = vector.broadcast %366 : vector<8x1xf32> to vector<8x16xf32>
    %375 = arith.mulf %374, %373 : vector<8x16xf32>
    %376 = arith.addf %365, %375 : vector<8x16xf32>
    %377 = vector.broadcast %31 : vector<1x16xf32> to vector<8x16xf32>
    %378 = arith.mulf %376, %377 : vector<8x16xf32>
    %c0_92 = arith.constant 0 : index
    %c0_93 = arith.constant 0 : index
    %c0_94 = arith.constant 0 : index
    %379 = vector.load %arg3[%c0_92, %c0_93, %c0_94] : memref<1x8x16xf32, #tpu.memory_space<vmem>>, vector<1x8x16xf32>
    %380 = vector.shape_cast %379 : vector<1x8x16xf32> to vector<8x16xf32>
    %381 = vector.shape_cast %378 : vector<8x16xf32> to vector<1x8x16xf32>
    tpu.vector_store %arg3[%c0_92, %c0_93, %c0_94], %381 {strides = array<i32>} : memref<1x8x16xf32, #tpu.memory_space<vmem>>, vector<1x8x16xf32>,
    return
  }
  func.func @transform_0(%arg0: i32) -> (i32, i32, i32) {
    %c0_i32 = arith.constant 0 : i32
    %c0_i32_0 = arith.constant 0 : i32
    %c0_i32_1 = arith.constant 0 : i32
    return %arg0, %c0_i32, %c0_i32_0 : i32, i32, i32
  }
  func.func @transform_1(%arg0: i32) -> (i32, i32) {
    %c0_i32 = arith.constant 0 : i32
    %c0_i32_0 = arith.constant 0 : i32
    %c0_i32_1 = arith.constant 0 : i32
    return %c0_i32, %c0_i32_0 : i32, i32
  }
  func.func @transform_2(%arg0: i32) -> (i32, i32, i32) {
    %c0_i32 = arith.constant 0 : i32
    %c0_i32_0 = arith.constant 0 : i32
    %c0_i32_1 = arith.constant 0 : i32
    return %arg0, %c0_i32, %c0_i32_0 : i32, i32, i32
  }
}

</mosaic_0001>

<bundles_post_ra>
// kernel: tpu_custom_call.1
= control target key start
LH: loop header
LB: loop body
LE: loop exit
PB: predicated region body
PF: predicated region fallthrough
CT: control target
= control target key end

     0   :  { %7 = vsyncpa [#allocation3], 0  ;;  %s1047_s0 = inlined_call_operand.hbm [shape: f32[1,8,16], index: 0, kind: input, shape index: {}]   ;;  %s1048_s1 = inlined_call_operand.hbm [shape: f32[24,33], index: 1, kind: input, shape index: {}]   ;;  %s1049_s2 = inlined_call_operand.hbm [shape: f32[1,8,16], index: 2, kind: output, shape index: {}]  }
   0x1   :  { %8 = vsyncpa [#allocation6], 0 }
   0x2   :  { %9 = vsyncpa [#allocation4], 0  ;;  %s750_s9 = smov [#allocation2]   ;;  %s751_s11 = smov [#allocation5]  }
   0x3   :  { %s16_s10 = sshll.u32 %s750_s9, 4  ;;  %s25_s12 = sshll.u32 %s751_s11, 4  ;;  %s17_s10 = int_to_ptr.vmem [resolvable:$true] %s16_s10  ;;  %s807_s12 = int_to_ptr.vmem [resolvable:$true] %s25_s12 }
   0x4   :  { %s678_s15 = scalar_lea.hbm %s1047_s0, 128 }
   0x5   :  { %p679_p0 = scmp.ne.s32.totalorder %s1047_s0, %s678_s15  ;;  %p682_p1 = scmp.lt.u32.totalorder %s678_s15, %s1047_s0 }
   0x7   :  { %p684_p2 = pnand %p682_p1, %p679_p0 }
   0x9   :  { %687 = shalt.err (!%p684_p2)
}
   0xa   :  { %s688_s20 = scalar_lea.vmem %s17_s10, 128  ;;  %p693_p4 = scmp.lt.s32.totalorder %s17_s10, %s17_s10 }
   0xb   :  { %p689_p3 = scmp.ne.s32.totalorder %s17_s10, %s688_s20  ;;  %p694_p5 = scmp.lt.s32.totalorder %s688_s20, %s688_s20 }
   0xd   :  { %p695_p6 = por %p694_p5, %p693_p4 }
   0xf   :  { %p696_p7 = pnand %p695_p6, %p689_p3 }
  0x11   :  { %699 = shalt.err (!%p696_p7)
}
  0x12   :  { %19 = dma.hbm_to_vmem [thread:$0]  %s1047_s0, 128, %s17_s10, [#allocation3]  }
  0x13   :  { %s700_s25 = scalar_lea.hbm %s1048_s1, 384 }
  0x14   :  { %p701_p8 = scmp.ne.s32.totalorder %s1048_s1, %s700_s25  ;;  %p704_p9 = scmp.lt.u32.totalorder %s700_s25, %s1048_s1 }
  0x16   :  { %p706_p10 = pnand %p704_p9, %p701_p8 }
  0x18   :  { %709 = shalt.err (!%p706_p10)
}
  0x19   :  { %s710_s30 = scalar_lea.vmem %s807_s12, 384  ;;  %p715_p12 = scmp.lt.s32.totalorder %s807_s12, %s807_s12 }
  0x1a   :  { %p711_p11 = scmp.ne.s32.totalorder %s807_s12, %s710_s30  ;;  %p716_p13 = scmp.lt.s32.totalorder %s710_s30, %s710_s30 }
  0x1c   :  { %p717_p0 = por %p716_p13, %p715_p12 }
  0x1e   :  { %p718_p1 = pnand %p717_p0, %p711_p11 }
  0x20   :  { %721 = shalt.err (!%p718_p1)
}
  0x21   :  { %s752_s0 = smov 128   ;;  %s753_s3 = smov 8  }
  0x22   :  { %31 = dma.hbm_to_vmem [thread:$0]  %s1048_s1, 384, %s807_s12, [#allocation6], %s752_s0, %s752_s0, %s753_s3  }
  0x23   :  { %744 = dma.done.wait [#allocation3], 128  }
  0x24   :  { %745 = vsyncadd [#allocation3], 4294967168 }
  0x25   :  { %746 = dma.done.wait [#allocation6], 384  }
  0x26   :  { %747 = vsyncadd [#allocation6], 4294966912  ;;  %v38_v0 = vld [vmem:[#allocation2] sm:$0xff]  ;;  %s754_s6 = smov 16   ;;  %vm42_vm0 = vcmask 1047680   ;;  %v755_v3 = vmov 0.0|0.0   ;;  %v39_v7 = vlaneseq }
  0x27   :  { %43 = vrot.lane.b32.xlu0 %v38_v0, %s754_s6  ;;  %588 = vmatprep.subr.bf16.mxu0 %v755_v3  ;;  %s756_s1 = smov 113   ;;  %s757_s7 = smov 115   ;;  %vm758_vm1 = vmmov 0   ;;  %v759_v6 = vmov 0.0   ;;  %vm761_vm6 = vmmov 1   ;;  %vm83_vm8 = vcmask 1040384  }
  0x28   :  { %596 = vmatprep.subr.bf16.mxu1 %v755_v3  ;;  %582 = vmatprep.mubr.msk.f32.mxu1 %vm758_vm1, %v759_v6  ;;  %s760_s8 = smov 114   ;;  %v847_v8 = vand.u32 127, %v39_v7  ;;  %v71_v14 = vld [vmem:[#allocation5 + $0x8] sm:$0xff]  ;;  %vm73_vm9 = vcmask 269312   ;;  %v70_v15 = vld [vmem:[#allocation5] sm:$0xff]  ;;  %v762_v16 = vmov 1.0  }
  0x29   :  { %579 = vmatprep.mubr.msk.f32.mxu0 %vm758_vm1, %v759_v6  ;;  %v72_v17 = vld [vmem:[#allocation5 + $0x10] sm:$0xff]  ;;  %v763_v18 = vmov 12   ;;  %v764_v19 = vmov 14   ;;  %v765_v26 = vmov 13   ;;  %v766_v27 = vmov 11   ;;  %s774_s9 = smov 116  }
  0x2a   :  { %vm41_vm2 = vcmp.ge.s32.totalorder %v847_v8, 3  ;;  %vm56_vm3 = vcmp.ge.s32.totalorder %v847_v8, 2  ;;  %vm63_vm5 = vcmp.ge.s32.totalorder %v847_v8, 1  ;;  %646 = vset.pattern.permute.xlu0 %v763_v18  ;;  %644 = vset.pattern.permute.xlu1 %v764_v19  ;;  %v767_v28 = vmov 10   ;;  %s776_s10 = smov 117   ;;  %s778_s11 = smov 118  }
  0x2b   :  { %vm590_vm4 = vmpackc.low %vm56_vm3, %vm41_vm2  ;;  %v768_v29 = vmov 9   ;;  %v769_v30 = vmov 8   ;;  %v770_v31 = vmov 7   ;;  %v771_v32 = vmov 6   ;;  %s780_s12 = smov 119   ;;  %s782_s13 = smov 120  }
  0x2c   :  { %vm594_vm7 = vmpackc.low %vm761_vm6, %vm63_vm5  ;;  %v772_v33 = vmov 5   ;;  %v773_v36 = vmov 15   ;;  %v775_v39 = vmov 4   ;;  %v777_v40 = vmov 3   ;;  %s783_s14 = smov 121   ;;  %s785_s15 = smov 122  }
  0x2d   :  { %v779_v41 = vmov 2   ;;  %v781_v42 = vmov 1   ;;  %v784_v43 = vmov 0   ;;  %s786_s16 = smov 126   ;;  %s787_s17 = smov 123   ;;  %vm214_vm10 = vcmp.ge.s32.totalorder %v847_v8, 4 }
  0x2e   :  { %s788_s18 = smov 124   ;;  %s789_s19 = smov 125   ;;  %vm227_vm11 = vcmp.ge.s32.totalorder %v847_v8, 5  ;;  %vm240_vm12 = vcmp.ge.s32.totalorder %v847_v8, 6  ;;  %vm253_vm13 = vcmp.ge.s32.totalorder %v847_v8, 7  ;;  %vm266_vm14 = vcmp.ge.s32.totalorder %v847_v8, 8 }
  0x2f   :  { %s790_s20 = smov 127   ;;  %vm279_vm15 = vcmp.ge.s32.totalorder %v847_v8, 9  ;;  %vm318_vm6 = vcmp.ge.s32.totalorder %v847_v8, 12  ;;  %s791_s21 = smov [#allocation7]  }
  0x30   :  { %s544_s22 = sshll.u32 %s791_s21, 4  ;;  %s545_s22 = int_to_ptr.vmem [resolvable:$true] %s544_s22 }
  0x31   :  { %s722_s23 = scalar_lea.vmem %s545_s22, 128  ;;  %p727_p3 = scmp.lt.s32.totalorder %s545_s22, %s545_s22 }
  0x32   :  { %p723_p2 = scmp.ne.s32.totalorder %s545_s22, %s722_s23  ;;  %p728_p4 = scmp.lt.s32.totalorder %s722_s23, %s722_s23 }
  0x34   :  { %p729_p5 = por %p728_p4, %p727_p3 }
  0x36   :  { %p730_p6 = pnand %p729_p5, %p723_p2 }
  0x99   :  { %v44_v1 = vpop.permute.xlu0 %43 }
  0x9a   :  { %v45_v2 = vsel %vm42_vm0, %v44_v1, %v38_v0 }
  0x9b   :  { %46 = vrot.lane.b32.xlu0 %v45_v2, %s754_s6 }
 0x10d   :  { %v47_v4 = vpop.permute.xlu0 %46 }
 0x10e   :  { %v48_v5 = vsel %vm42_vm0, %v47_v4, %v38_v0 }
 0x10f   :  { %66 = vrot.lane.b32.xlu0 %v48_v5, %s756_s1  ;;  %52 = vrot.lane.b32.xlu1 %v48_v5, %s757_s7 }
 0x113   :  { %59 = vrot.lane.b32.xlu1 %v48_v5, %s760_s8 }
 0x181   :  { %v53_v9 = vpop.permute.xlu1 %52  ;;  %v67_v12 = vpop.permute.xlu0 %66 }
 0x182   :  { %v593_v13 = vpack.c.bf16 %v38_v0, %v67_v12 }
 0x185   :  { %v60_v10 = vpop.permute.xlu1 %59 }
 0x186   :  { %v589_v11 = vpack.c.bf16 %v60_v10, %v53_v9 }
 0x188   :  { %591 = vmatpush3.bf16.msk.msra.mxu0 %vm590_vm4, %v589_v11  ;;  %599 = vmatpush3.bf16.msk.msra.mxu1 %vm590_vm4, %v589_v11  ;;  %vm305_vm4 = vcmp.ge.s32.totalorder %v847_v8, 11 }
 0x189   :  { %592 = vmatprep.subr.bf16.mxu0 %v755_v3  ;;  %597 = vmatprep.subr.bf16.mxu1 %v755_v3 }
 0x18c   :  { %595 = vmatpush3.bf16.msk.msra.mxu0 %vm594_vm7, %v593_v13  ;;  %600 = vmatpush3.bf16.msk.msra.mxu1 %vm594_vm7, %v593_v13  ;;  %vm331_vm7 = vcmp.ge.s32.totalorder %v847_v8, 13 }
 0x18d   :  { %598 = vmatprep.subr.mxu1 %v759_v6  ;;  %577 = vmatprep.subr.mxu0 %v759_v6 }
 0x190   :  { %601 = vmatpush3.msk.msra.mxu1 %vm83_vm8, %v762_v16  ;;  %578 = vmatpush3.msk.msra.mxu0 %vm83_vm8, %v762_v16  ;;  %vm344_vm8 = vcmp.ge.s32.totalorder %v847_v8, 14 }
 0x191   :  { %583 = vmatmul.mubr.msk.f32.vlgmr.msra.gmra.mrb[0].mxu1 %vm73_vm9, %v71_v14  ;;  %580 = vmatmul.mubr.msk.f32.vlgmr.msra.gmra.mrb[0].mxu0 %vm73_vm9, %v70_v15 }
 0x192   :  { %585 = vmatprep.mubr.msk.f32.mxu1 %vm758_vm1, %v759_v6  ;;  %vm292_vm1 = vcmp.ge.s32.totalorder %v847_v8, 10 }
 0x195   :  { %586 = vmatmul.mubr.msk.f32.gmra.mrb[2].mxu1 %vm73_vm9, %v72_v17  ;;  %vm357_vm9 = vcmp.ge.s32.totalorder %v847_v8, 15 }
 0x264   :  { %v861_v20 = vpop.f32.mrb[0].mxu1  ;;  %v863_v21 = vpop.f32.mrb[0].mxu0 }
 0x265   :  { %177 = vrot.lane.b32.xlu1 %v861_v20, %s754_s6  ;;  %v584_v22 = vpop.f32.mrb[1].mxu1  ;;  %v581_v23 = vpop.f32.mrb[1].mxu0 }
 0x268   :  { %v867_v24 = vpop.f32.mrb[2].mxu1 }
 0x269   :  { %378 = vrot.lane.b32.xlu1 %v867_v24, %s754_s6  ;;  %v587_v25 = vpop.f32.mrb[3].mxu1 }
 0x26d   :  { %189 = vperm.xlu1 %644, %v863_v21  }
 0x271   :  { %645 = vset.pattern.permute.xlu1 %v765_v26 }
 0x272   :  { %199 = vperm.xlu1 %645, %v863_v21  }
 0x276   :  { %648 = vset.pattern.permute.xlu1 %v766_v27 }
 0x277   :  { %222 = vperm.xlu1 %648, %v863_v21  }
 0x27b   :  { %649 = vset.pattern.permute.xlu1 %v767_v28 }
 0x27c   :  { %235 = vperm.xlu1 %649, %v863_v21  }
 0x280   :  { %650 = vset.pattern.permute.xlu1 %v768_v29 }
 0x281   :  { %248 = vperm.xlu1 %650, %v863_v21  }
 0x285   :  { %651 = vset.pattern.permute.xlu1 %v769_v30 }
 0x286   :  { %261 = vperm.xlu1 %651, %v863_v21  }
 0x28a   :  { %652 = vset.pattern.permute.xlu1 %v770_v31 }
 0x28b   :  { %274 = vperm.xlu1 %652, %v863_v21  }
 0x28f   :  { %653 = vset.pattern.permute.xlu1 %v771_v32 }
 0x290   :  { %287 = vperm.xlu1 %653, %v863_v21  }
 0x294   :  { %654 = vset.pattern.permute.xlu1 %v772_v33 }
 0x2d7   :  { %v178_v34 = vpop.permute.xlu1 %177 }
 0x2d8   :  { %v179_v35 = vsel %vm42_vm0, %v178_v34, %v861_v20 }
 0x2d9   :  { %180 = vrot.lane.b32.xlu0 %v179_v35, %s754_s6 }
 0x2db   :  { %v379_v44 = vpop.permute.xlu1 %378 }
 0x2dc   :  { %v380_v45 = vsel %vm42_vm0, %v379_v44, %v867_v24  ;;  %v167_v44 = vadd.s32 1, %v847_v8 }
 0x2dd   :  { %209 = vperm.xlu0 %646, %v863_v21  }
 0x2e1   :  { %647 = vset.pattern.permute.xlu0 %v773_v36 }
 0x2e2   :  { %172 = vperm.xlu0 %647, %v863_v21  }
 0x2ec   :  { %v190_v46 = vpop.permute.xlu1 %189 }
 0x2f1   :  { %v200_v47 = vpop.permute.xlu1 %199 }
 0x2f6   :  { %v223_v48 = vpop.permute.xlu1 %222 }
 0x2fb   :  { %v236_v49 = vpop.permute.xlu1 %235 }
 0x300   :  { %v249_v50 = vpop.permute.xlu1 %248 }
 0x305   :  { %v262_v52 = vpop.permute.xlu1 %261 }
 0x30a   :  { %v275_v54 = vpop.permute.xlu1 %274 }
 0x30f   :  { %v288_v57 = vpop.permute.xlu1 %287 }
 0x34b   :  { %v181_v37 = vpop.permute.xlu0 %180 }
 0x34c   :  { %v182_v38 = vsel %vm42_vm0, %v181_v37, %v861_v20 }
 0x34d   :  { %194 = vrot.lane.b32.xlu0 %v182_v38, %s760_s8  ;;  %184 = vrot.lane.b32.xlu1 %v182_v38, %s756_s1 }
 0x351   :  { %204 = vrot.lane.b32.xlu0 %v182_v38, %s757_s7  ;;  %300 = vperm.xlu1 %654, %v863_v21  }
 0x355   :  { %217 = vrot.lane.b32.xlu0 %v182_v38, %s774_s9  ;;  %655 = vset.pattern.permute.xlu1 %v775_v39 }
 0x356   :  { %313 = vperm.xlu1 %655, %v863_v21  }
 0x359   :  { %230 = vrot.lane.b32.xlu0 %v182_v38, %s776_s10 }
 0x35a   :  { %656 = vset.pattern.permute.xlu1 %v777_v40 }
 0x35b   :  { %326 = vperm.xlu1 %656, %v863_v21  }
 0x35c   :  { %v210_v51 = vpop.permute.xlu0 %209 }
 0x35d   :  { %243 = vrot.lane.b32.xlu0 %v182_v38, %s778_s11 }
 0x35f   :  { %657 = vset.pattern.permute.xlu1 %v779_v41 }
 0x360   :  { %339 = vperm.xlu1 %657, %v863_v21  }
 0x361   :  { %256 = vrot.lane.b32.xlu0 %v182_v38, %s780_s12  ;;  %v173_v53 = vpop.permute.xlu0 %172 }
 0x362   :  { %v175_v1 = vmul.f32 %v173_v53, %v861_v20  ;;  %v168_v53 = vcvt.s32.f32 %v167_v44 }
 0x364   :  { %658 = vset.pattern.permute.xlu1 %v781_v42  ;;  %676 = vrsqrt.f32 %v168_v53 }
 0x365   :  { %269 = vrot.lane.b32.xlu0 %v182_v38, %s782_s13  ;;  %352 = vperm.xlu1 %658, %v863_v21  }
 0x369   :  { %282 = vrot.lane.b32.xlu0 %v182_v38, %s783_s14  ;;  %659 = vset.pattern.permute.xlu1 %v784_v43 }
 0x36a   :  { %365 = vperm.xlu1 %659, %v863_v21  }
 0x36d   :  { %295 = vrot.lane.b32.xlu0 %v182_v38, %s785_s15 }
 0x36e   :  { %347 = vrot.lane.b32.xlu1 %v182_v38, %s786_s16 }
 0x36f   :  { %660 = vset.pattern.permute.xlu1 %v764_v19 }
 0x371   :  { %308 = vrot.lane.b32.xlu0 %v182_v38, %s787_s17 }
 0x372   :  { %381 = vrot.lane.b32.xlu1 %v380_v45, %s754_s6 }
 0x375   :  { %321 = vrot.lane.b32.xlu0 %v182_v38, %s788_s18 }
 0x379   :  { %334 = vrot.lane.b32.xlu0 %v182_v38, %s789_s19 }
 0x37d   :  { %360 = vrot.lane.b32.xlu0 %v182_v38, %s790_s20 }
 0x3bf   :  { %v195_v55 = vpop.permute.xlu0 %194  ;;  %v185_v59 = vpop.permute.xlu1 %184 }
 0x3c0   :  { %v187_v61 = vsel %vm63_vm5, %v185_v59, 0.0  ;;  %v197_v2 = vsel %vm56_vm3, %v195_v55, 0.0 }
 0x3c1   :  { %v192_v62 = vmul.f32 %v190_v46, %v187_v61  ;;  %v202_v6 = vmul.f32 %v200_v47, %v197_v2 }
 0x3c3   :  { %v205_v56 = vpop.permute.xlu0 %204  ;;  %v193_v3 = vadd.f32 %v192_v62, %v175_v1 }
 0x3c4   :  { %v207_v5 = vsel %vm41_vm2, %v205_v56, 0.0 }
 0x3c5   :  { %v203_v10 = vadd.f32 %v202_v6, %v193_v3  ;;  %v212_v11 = vmul.f32 %v210_v51, %v207_v5 }
 0x3c7   :  { %v218_v58 = vpop.permute.xlu0 %217  ;;  %v213_v17 = vadd.f32 %v212_v11, %v203_v10 }
 0x3c8   :  { %v220_v9 = vsel %vm214_vm10, %v218_v58, 0.0 }
 0x3c9   :  { %v225_v14 = vmul.f32 %v223_v48, %v220_v9 }
 0x3cb   :  { %v231_v60 = vpop.permute.xlu0 %230  ;;  %v226_v22 = vadd.f32 %v225_v14, %v213_v17  ;;  %v968_v14 = vpop.eup %676 }
 0x3cc   :  { %v233_v13 = vsel %vm227_vm11, %v231_v60, 0.0 }
 0x3cd   :  { %v238_v19 = vmul.f32 %v236_v49, %v233_v13 }
 0x3cf   :  { %v244_v63 = vpop.permute.xlu0 %243  ;;  %v239_v34 = vadd.f32 %v238_v19, %v226_v22 }
 0x3d0   :  { %v301_v0 = vpop.permute.xlu1 %300  ;;  %v246_v15 = vsel %vm240_vm12, %v244_v63, 0.0 }
 0x3d1   :  { %v251_v23 = vmul.f32 %v249_v50, %v246_v15 }
 0x3d3   :  { %v257_v4 = vpop.permute.xlu0 %256  ;;  %v252_v45 = vadd.f32 %v251_v23, %v239_v34 }
 0x3d4   :  { %v259_v21 = vsel %vm253_vm13, %v257_v4, 0.0 }
 0x3d5   :  { %v314_v7 = vpop.permute.xlu1 %313  ;;  %v264_v35 = vmul.f32 %v262_v52, %v259_v21 }
 0x3d7   :  { %v270_v12 = vpop.permute.xlu0 %269  ;;  %v265_v48 = vadd.f32 %v264_v35, %v252_v45 }
 0x3d8   :  { %v272_v25 = vsel %vm266_vm14, %v270_v12, 0.0 }
 0x3d9   :  { %v277_v46 = vmul.f32 %v275_v54, %v272_v25 }
 0x3da   :  { %v327_v16 = vpop.permute.xlu1 %326 }
 0x3db   :  { %v283_v20 = vpop.permute.xlu0 %282  ;;  %v278_v55 = vadd.f32 %v277_v46, %v265_v48 }
 0x3dc   :  { %v285_v38 = vsel %vm279_vm15, %v283_v20, 0.0 }
 0x3dd   :  { %v290_v49 = vmul.f32 %v288_v57, %v285_v38 }
 0x3df   :  { %v296_v36 = vpop.permute.xlu0 %295  ;;  %v340_v37 = vpop.permute.xlu1 %339  ;;  %v291_v58 = vadd.f32 %v290_v49, %v278_v55 }
 0x3e0   :  { %v298_v47 = vsel %vm292_vm1, %v296_v36, 0.0 }
 0x3e1   :  { %v303_v56 = vmul.f32 %v301_v0, %v298_v47 }
 0x3e3   :  { %v309_v50 = vpop.permute.xlu0 %308  ;;  %v304_v61 = vadd.f32 %v303_v56, %v291_v58 }
 0x3e4   :  { %v311_v51 = vsel %vm305_vm4, %v309_v50, 0.0  ;;  %v353_v52 = vpop.permute.xlu1 %352 }
 0x3e5   :  { %v316_v59 = vmul.f32 %v314_v7, %v311_v51 }
 0x3e7   :  { %v322_v54 = vpop.permute.xlu0 %321  ;;  %v317_v63 = vadd.f32 %v316_v59, %v304_v61 }
 0x3e8   :  { %v324_v60 = vsel %vm318_vm6, %v322_v54, 0.0 }
 0x3e9   :  { %v329_v62 = vmul.f32 %v327_v16, %v324_v60  ;;  %v366_v57 = vpop.permute.xlu1 %365 }
 0x3eb   :  { %v335_v1 = vpop.permute.xlu0 %334  ;;  %v330_v2 = vadd.f32 %v329_v62, %v317_v63 }
 0x3ec   :  { %v337_v0 = vsel %vm331_vm7, %v335_v1, 0.0 }
 0x3ed   :  { %v342_v3 = vmul.f32 %v340_v37, %v337_v0  ;;  %v348_v4 = vpop.permute.xlu1 %347 }
 0x3ee   :  { %v350_v5 = vsel %vm344_vm8, %v348_v4, 0.0 }
 0x3ef   :  { %v343_v6 = vadd.f32 %v342_v3, %v330_v2  ;;  %v355_v7 = vmul.f32 %v353_v52, %v350_v5  ;;  %v361_v9 = vpop.permute.xlu0 %360 }
 0x3f0   :  { %v363_v10 = vsel %vm357_vm9, %v361_v9, 0.0 }
 0x3f1   :  { %v356_v11 = vadd.f32 %v355_v7, %v343_v6  ;;  %v368_v12 = vmul.f32 %v366_v57, %v363_v10  ;;  %v382_v13 = vpop.permute.xlu1 %381 }
 0x3f2   :  { %v383_v15 = vsel %vm42_vm0, %v382_v13, %v867_v24  ;;  %vm536_vm0 = vcmask 130048  }
 0x3f3   :  { %v369_v16 = vadd.f32 %v368_v12, %v356_v11  ;;  %395 = vrot.lane.b32.xlu0 %v383_v15, %s760_s8  ;;  %385 = vrot.lane.b32.xlu1 %v383_v15, %s756_s1 }
 0x3f5   :  { %v370_v17 = vmul.f32 %v968_v14, %v369_v16 }
 0x3f7   :  { %405 = vrot.lane.b32.xlu0 %v383_v15, %s757_s7  ;;  %390 = vperm.xlu1 %660, %v370_v17  }
 0x3fb   :  { %415 = vrot.lane.b32.xlu0 %v383_v15, %s774_s9  ;;  %661 = vset.pattern.permute.xlu1 %v765_v26 }
 0x3fc   :  { %400 = vperm.xlu1 %661, %v370_v17  }
 0x3ff   :  { %425 = vrot.lane.b32.xlu0 %v383_v15, %s776_s10 }
 0x400   :  { %663 = vset.pattern.permute.xlu1 %v766_v27 }
 0x401   :  { %420 = vperm.xlu1 %663, %v370_v17  }
 0x403   :  { %435 = vrot.lane.b32.xlu0 %v383_v15, %s778_s11 }
 0x405   :  { %664 = vset.pattern.permute.xlu1 %v767_v28 }
 0x406   :  { %430 = vperm.xlu1 %664, %v370_v17  }
 0x407   :  { %445 = vrot.lane.b32.xlu0 %v383_v15, %s780_s12 }
 0x40a   :  { %665 = vset.pattern.permute.xlu1 %v768_v29 }
 0x40b   :  { %373 = vperm.xlu0 %647, %v370_v17   ;;  %440 = vperm.xlu1 %665, %v370_v17  }
 0x40f   :  { %662 = vset.pattern.permute.xlu0 %v763_v18  ;;  %666 = vset.pattern.permute.xlu1 %v769_v30 }
 0x410   :  { %410 = vperm.xlu0 %662, %v370_v17   ;;  %450 = vperm.xlu1 %666, %v370_v17  }
 0x414   :  { %455 = vrot.lane.b32.xlu0 %v383_v15, %s782_s13  ;;  %667 = vset.pattern.permute.xlu1 %v770_v31 }
 0x415   :  { %460 = vperm.xlu1 %667, %v370_v17   ;;  %675 = vset.pattern.permute.xlu0 %v784_v43 }
 0x418   :  { %465 = vrot.lane.b32.xlu0 %v383_v15, %s783_s14 }
 0x419   :  { %668 = vset.pattern.permute.xlu1 %v771_v32 }
 0x41a   :  { %470 = vperm.xlu1 %668, %v370_v17  }
 0x41c   :  { %475 = vrot.lane.b32.xlu0 %v383_v15, %s785_s15 }
 0x41e   :  { %669 = vset.pattern.permute.xlu1 %v772_v33 }
 0x41f   :  { %480 = vperm.xlu1 %669, %v370_v17  }
 0x420   :  { %485 = vrot.lane.b32.xlu0 %v383_v15, %s787_s17 }
 0x423   :  { %670 = vset.pattern.permute.xlu1 %v775_v39 }
 0x424   :  { %495 = vrot.lane.b32.xlu0 %v383_v15, %s788_s18  ;;  %490 = vperm.xlu1 %670, %v370_v17  }
 0x428   :  { %505 = vrot.lane.b32.xlu0 %v383_v15, %s789_s19  ;;  %671 = vset.pattern.permute.xlu1 %v777_v40 }
 0x429   :  { %500 = vperm.xlu1 %671, %v370_v17  }
 0x42c   :  { %525 = vrot.lane.b32.xlu0 %v383_v15, %s790_s20 }
 0x42d   :  { %672 = vset.pattern.permute.xlu1 %v779_v41 }
 0x42e   :  { %510 = vperm.xlu1 %672, %v370_v17  }
 0x432   :  { %673 = vset.pattern.permute.xlu1 %v781_v42 }
 0x433   :  { %520 = vperm.xlu1 %673, %v370_v17  }
 0x437   :  { %674 = vset.pattern.permute.xlu1 %v784_v43 }
 0x438   :  { %530 = vperm.xlu1 %674, %v370_v17  }
 0x43c   :  { %515 = vrot.lane.b32.xlu1 %v383_v15, %s786_s16 }
 0x465   :  { %v396_v18 = vpop.permute.xlu0 %395  ;;  %v386_v27 = vpop.permute.xlu1 %385 }
 0x466   :  { %v388_v43 = vsel %vm63_vm5, %v386_v27, 0.0  ;;  %v398_v25 = vsel %vm56_vm3, %v396_v18, 0.0 }
 0x469   :  { %v406_v26 = vpop.permute.xlu0 %405 }
 0x46a   :  { %v408_v36 = vsel %vm41_vm2, %v406_v26, 0.0 }
 0x46d   :  { %v416_v28 = vpop.permute.xlu0 %415 }
 0x46e   :  { %v418_v46 = vsel %vm214_vm10, %v416_v28, 0.0 }
 0x471   :  { %v426_v30 = vpop.permute.xlu0 %425 }
 0x472   :  { %v428_v51 = vsel %vm227_vm11, %v426_v30, 0.0 }
 0x475   :  { %v436_v33 = vpop.permute.xlu0 %435 }
 0x476   :  { %v391_v29 = vpop.permute.xlu1 %390  ;;  %v438_v58 = vsel %vm240_vm12, %v436_v33, 0.0 }
 0x477   :  { %v393_v21 = vmul.f32 %v391_v29, %v388_v43 }
 0x479   :  { %v446_v40 = vpop.permute.xlu0 %445 }
 0x47a   :  { %v448_v60 = vsel %vm253_vm13, %v446_v40, 0.0 }
 0x47b   :  { %v401_v31 = vpop.permute.xlu1 %400 }
 0x47c   :  { %v403_v35 = vmul.f32 %v401_v31, %v398_v25 }
 0x480   :  { %v421_v32 = vpop.permute.xlu1 %420 }
 0x481   :  { %v423_v47 = vmul.f32 %v421_v32, %v418_v46 }
 0x485   :  { %v431_v39 = vpop.permute.xlu1 %430 }
 0x486   :  { %v433_v52 = vmul.f32 %v431_v39, %v428_v51 }
 0x48a   :  { %v441_v41 = vpop.permute.xlu1 %440  ;;  %v374_v19 = vpop.permute.xlu0 %373 }
 0x48b   :  { %v376_v42 = vmul.f32 %v374_v19, %v867_v24  ;;  %v443_v59 = vmul.f32 %v441_v41, %v438_v58 }
 0x48d   :  { %v394_v23 = vadd.f32 %v393_v21, %v376_v42 }
 0x48f   :  { %v451_v20 = vpop.permute.xlu1 %450  ;;  %v411_v22 = vpop.permute.xlu0 %410  ;;  %v404_v37 = vadd.f32 %v403_v35, %v394_v23 }
 0x490   :  { %v413_v38 = vmul.f32 %v411_v22, %v408_v36  ;;  %v453_v62 = vmul.f32 %v451_v20, %v448_v60 }
 0x492   :  { %v414_v24 = vadd.f32 %v413_v38, %v404_v37 }
 0x493   :  { %v456_v44 = vpop.permute.xlu0 %455 }
 0x494   :  { %v461_v34 = vpop.permute.xlu1 %460  ;;  %v424_v50 = vadd.f32 %v423_v47, %v414_v24  ;;  %v458_v63 = vsel %vm266_vm14, %v456_v44, 0.0 }
 0x495   :  { %v463_v0 = vmul.f32 %v461_v34, %v458_v63 }
 0x496   :  { %v434_v53 = vadd.f32 %v433_v52, %v424_v50 }
 0x497   :  { %v466_v48 = vpop.permute.xlu0 %465 }
 0x498   :  { %v444_v54 = vadd.f32 %v443_v59, %v434_v53  ;;  %v468_v3 = vsel %vm279_vm15, %v466_v48, 0.0 }
 0x499   :  { %v471_v45 = vpop.permute.xlu1 %470 }
 0x49a   :  { %v454_v1 = vadd.f32 %v453_v62, %v444_v54  ;;  %v473_v6 = vmul.f32 %v471_v45, %v468_v3 }
 0x49b   :  { %v476_v55 = vpop.permute.xlu0 %475 }
 0x49c   :  { %v464_v4 = vadd.f32 %v463_v0, %v454_v1  ;;  %v478_v7 = vsel %vm292_vm1, %v476_v55, 0.0 }
 0x49e   :  { %v481_v49 = vpop.permute.xlu1 %480  ;;  %v474_v10 = vadd.f32 %v473_v6, %v464_v4 }
 0x49f   :  { %v486_v57 = vpop.permute.xlu0 %485  ;;  %v483_v11 = vmul.f32 %v481_v49, %v478_v7 }
 0x4a0   :  { %v488_v12 = vsel %vm305_vm4, %v486_v57, 0.0 }
 0x4a1   :  { %v484_v17 = vadd.f32 %v483_v11, %v474_v10 }
 0x4a3   :  { %v491_v56 = vpop.permute.xlu1 %490  ;;  %v496_v5 = vpop.permute.xlu0 %495 }
 0x4a4   :  { %v493_v13 = vmul.f32 %v491_v56, %v488_v12  ;;  %v498_v16 = vsel %vm318_vm6, %v496_v5, 0.0 }
 0x4a6   :  { %v494_v28 = vadd.f32 %v493_v13, %v484_v17 }
 0x4a7   :  { %v506_v15 = vpop.permute.xlu0 %505 }
 0x4a8   :  { %v501_v61 = vpop.permute.xlu1 %500  ;;  %v508_v27 = vsel %vm331_vm7, %v506_v15, 0.0 }
 0x4a9   :  { %v503_v18 = vmul.f32 %v501_v61, %v498_v16 }
 0x4ab   :  { %v504_v30 = vadd.f32 %v503_v18, %v494_v28  ;;  %v526_v31 = vpop.permute.xlu0 %525 }
 0x4ac   :  { %v528_v41 = vsel %vm357_vm9, %v526_v31, 0.0 }
 0x4ad   :  { %v511_v2 = vpop.permute.xlu1 %510 }
 0x4ae   :  { %v513_v29 = vmul.f32 %v511_v2, %v508_v27 }
 0x4b0   :  { %v514_v39 = vadd.f32 %v513_v29, %v504_v30 }
 0x4b2   :  { %v521_v9 = vpop.permute.xlu1 %520 }
 0x4b7   :  { %v531_v26 = vpop.permute.xlu1 %530 }
 0x4b8   :  { %v533_v19 = vmul.f32 %v531_v26, %v528_v41 }
 0x4bb   :  { %v516_v32 = vpop.permute.xlu1 %515 }
 0x4bc   :  { %v518_v33 = vsel %vm344_vm8, %v516_v32, 0.0 }
 0x4bd   :  { %v523_v40 = vmul.f32 %v521_v9, %v518_v33 }
 0x4bf   :  { %v524_v42 = vadd.f32 %v523_v40, %v514_v39 }
 0x4c1   :  { %v534_v20 = vadd.f32 %v533_v19, %v524_v42 }
 0x4c3   :  { %v535_v43 = vmul.f32 %v968_v14, %v534_v20 }
 0x4c5   :  { %537 = vst.msk [vmem:[#allocation7] sm:$0xff] %vm536_vm0, %v535_v43 }
 0x4c6   :  { %733 = shalt.err (!%p730_p6)
}
 0x4c7   :  { %s734_s26 = scalar_lea.hbm %s1049_s2, 128 }
 0x4c8   :  { %p735_p7 = scmp.ne.s32.totalorder %s1049_s2, %s734_s26  ;;  %p738_p8 = scmp.lt.u32.totalorder %s734_s26, %s1049_s2 }
 0x4ca   :  { %p740_p9 = pnand %p738_p8, %p735_p7 }
 0x4cc   :  { %743 = shalt.err (!%p740_p9)
}
 0x4cd   :  { %547 = dma.vmem_to_hbm [thread:$0]  %s545_s22, 128, %s1049_s2, [#allocation4]  }
 0x4ce   :  { %748 = dma.done.wait [#allocation4], 128  }
 0x4cf   :  { %749 = vsyncadd [#allocation4], 4294967168 }
 0x4d0   :  { %551 = vsyncpa [#allocation3], 1 }
 0x4d1   :  { %552 = vsyncpa [#allocation6], 1 }
 0x4d2   :  { %553 = vsyncpa [#allocation4], 1 }

</bundles_post_ra>
